<compile_context>
chip_gen: v6e
topology: v6e:2x2x1
jax: 0.10.0
libtpu: 0.0.40
codegen_flags: <defaults>
</compile_context>

<pallas_src>
import math

import jax
import jax.numpy as jnp
from jax.experimental import pallas as pl
from jax.experimental.pallas import tpu as pltpu


def _disc_kernel(xT_ref, w1T_ref, b1_ref, w2T_ref, b2_ref, w3_ref, b3_ref, o_ref):
    # xT_ref: (5, TB) feature-major batch tile.
    xT = xT_ref[...].astype(jnp.float32)

    # --- Linear(5, 256) + LeakyReLU(0.2) ---  (256,5) @ (5,TB) -> (256,TB)
    h1 = jnp.dot(w1T_ref[...], xT, preferred_element_type=jnp.float32)
    h1 = h1 + b1_ref[...]                      # (256,1) bias, lane-broadcast
    h1 = jnp.maximum(h1, 0.2 * h1)             # LeakyReLU(0.2)
    # Dropout(0.3): identity in eval mode.

    # --- Linear(256, 128) + LeakyReLU(0.2) --- the only layer with real FLOPs.
    w2T = w2T_ref[...]                         # (128, 256), f32 or bf16
    h2 = jnp.dot(w2T, h1.astype(w2T.dtype), preferred_element_type=jnp.float32)
    h2 = h2 + b2_ref[...]                      # (128,1) bias, lane-broadcast
    h2 = jnp.maximum(h2, 0.2 * h2)             # LeakyReLU(0.2)
    # Dropout(0.3): identity in eval mode.

    # --- Linear(128, 1) + Sigmoid ---
    # Single output feature: VPU multiply + XLU sublane reduction instead of
    # an MXU matmul with one live output column; result is a lane-dense
    # (1, TB) row, so the store is an unmasked full-width vst.
    logits = jnp.sum(h2 * w3_ref[...], axis=0, keepdims=True) + b3_ref[0, 0]
    o_ref[...] = (1.0 / (1.0 + jnp.exp(-logits))).astype(o_ref.dtype)


def discriminator_ring_forward(x, params, *, tb=512, use_bf16=False):
    """x: [B, 5] float32.  params: dict w1,b1,w2,b2,w3,b3.  Returns [B, 1]."""
    B, F = x.shape
    assert F == 5
    assert tb % 128 == 0, "tb must be a multiple of 128 (TPU lane width)"

    # Clamp the batch tile to the padded batch so tiny batches run one small tile.
    b_min = ((B + 127) // 128) * 128
    tb = min(tb, b_min)

    x = x.astype(jnp.float32)
    B_pad = ((B + tb - 1) // tb) * tb
    if B_pad != B:
        x = jnp.pad(x, ((0, B_pad - B), (0, 0)))
    xT = x.T                                             # (5, B_pad), feature-major

    # Re-layout parameters for the feature-major kernel (cheap, done by XLA).
    w1T = params["w1"].T.astype(jnp.float32)             # (256, 5)
    b1 = params["b1"].reshape(256, 1).astype(jnp.float32)
    w2T = params["w2"].T                                 # (128, 256)
    w2T = w2T.astype(jnp.bfloat16 if use_bf16 else jnp.float32)
    b2 = params["b2"].reshape(128, 1).astype(jnp.float32)
    w3 = params["w3"].reshape(128, 1).astype(jnp.float32)
    b3 = params["b3"].reshape(1, 1).astype(jnp.float32)  # SMEM scalar

    out = pl.pallas_call(
        _disc_kernel,
        out_shape=jax.ShapeDtypeStruct((1, B_pad), jnp.float32),
        grid_spec=pltpu.PrefetchScalarGridSpec(
            num_scalar_prefetch=0,
            grid=(B_pad // tb,),
            in_specs=[
                pl.BlockSpec((5, tb), lambda i: (0, i)),      # x.T batch tile
                pl.BlockSpec((256, 5), lambda i: (0, 0)),     # w1.T (full)
                pl.BlockSpec((256, 1), lambda i: (0, 0)),     # b1 column
                pl.BlockSpec((128, 256), lambda i: (0, 0)),   # w2.T (full)
                pl.BlockSpec((128, 1), lambda i: (0, 0)),     # b2 column
                pl.BlockSpec((128, 1), lambda i: (0, 0)),     # w3 column
                pl.BlockSpec(memory_space=pltpu.MemorySpace.SMEM),  # b3 scalar
            ],
            out_specs=pl.BlockSpec((1, tb), lambda i: (0, i)),
        ),
        compiler_params=pltpu.CompilerParams(
            dimension_semantics=("parallel",),   # shards batch tiles across TCs (v7x)
        ),
    )(xT, w1T, b1, w2T, b2, w3, b3)

    return out[0, :B].reshape(B, 1)


def init_params(key):
    """PyTorch nn.Linear default init: U(-1/sqrt(fan_in), +1/sqrt(fan_in))."""
    def linear(key, fan_in, fan_out):
        kw, kb = jax.random.split(key)
        bound = 1.0 / math.sqrt(fan_in)
        w = jax.random.uniform(kw, (fan_in, fan_out), jnp.float32, -bound, bound)
        b = jax.random.uniform(kb, (fan_out,), jnp.float32, -bound, bound)
        return w, b

    k1, k2, k3 = jax.random.split(key, 3)
    w1, b1 = linear(k1, 5, 256)
    w2, b2 = linear(k2, 256, 128)
    w3, b3 = linear(k3, 128, 1)
    return dict(w1=w1, b1=b1, w2=w2, b2=b2, w3=w3, b3=b3)


def _reference_forward(x, p):
    h1 = x @ p["w1"] + p["b1"]
    h1 = jnp.where(h1 > 0, h1, 0.2 * h1)
    h2 = h1 @ p["w2"] + p["b2"]
    h2 = jnp.where(h2 > 0, h2, 0.2 * h2)
    return jax.nn.sigmoid(h2 @ p["w3"] + p["b3"])


if __name__ == "__main__":
    key = jax.random.PRNGKey(0)
    kp, kx = jax.random.split(key)
    params = init_params(kp)

    B = 8  # small batch (padded internally to one 128-wide tile)
    x = jax.random.normal(kx, (B, 5), jnp.float32)

    ref = _reference_forward(x, params)

    # Full-precision path.
    out = jax.block_until_ready(discriminator_ring_forward(x, params))
    assert out.shape == (B, 1)
    assert jnp.allclose(out, ref, atol=2e-5, rtol=2e-5), "f32 mismatch vs reference"

    # bf16 weights on the dominant 256x128 matmul (v6e/v7x MXU fast path).
    out_bf16 = jax.block_until_ready(
        discriminator_ring_forward(x, params, use_bf16=True))
    assert jnp.allclose(out_bf16, ref, atol=1e-2, rtol=1e-2), "bf16 mismatch vs reference"

    # Multi-tile path (grid > 1) to exercise the batch tiling / parallel axis.
    B2 = 1111
    x2 = jax.random.normal(jax.random.PRNGKey(1), (B2, 5), jnp.float32)
    ref2 = _reference_forward(x2, params)
    out2 = jax.block_until_ready(discriminator_ring_forward(x2, params))
    assert out2.shape == (B2, 1)
    assert jnp.allclose(out2, ref2, atol=2e-5, rtol=2e-5), "multi-tile mismatch"

    print("KERNEL_OK")
</pallas_src>

<mosaic_0001>
module attributes {stable_mosaic.version = 11 : i64} {
  func.func @_disc_kernel(%arg0: i32, %arg1: memref<5x128xf32, #tpu.memory_space<vmem>>, %arg2: memref<256x5xf32, #tpu.memory_space<vmem>>, %arg3: memref<256x1xf32, #tpu.memory_space<vmem>>, %arg4: memref<128x256xf32, #tpu.memory_space<vmem>>, %arg5: memref<128x1xf32, #tpu.memory_space<vmem>>, %arg6: memref<128x1xf32, #tpu.memory_space<vmem>>, %arg7: memref<1x1xf32, #tpu.memory_space<smem>>, %arg8: memref<1x128xf32, #tpu.memory_space<vmem>>) attributes {dimension_semantics = [#tpu.dimension_semantics<parallel>], iteration_bounds = array<i64: 1>, scalar_prefetch = 0 : i64, scratch_operands = 0 : i64, tpu.core_type = #tpu.core_type<tc>, window_params = [{transform_indices = @transform_0, window_bounds = array<i64: 5, 128>}, {pipeline_mode = #tpu.pipeline_mode<synchronous>, transform_indices = @transform_1, window_bounds = array<i64: 256, 5>}, {pipeline_mode = #tpu.pipeline_mode<synchronous>, transform_indices = @transform_2, window_bounds = array<i64: 256, 1>}, {pipeline_mode = #tpu.pipeline_mode<synchronous>, transform_indices = @transform_3, window_bounds = array<i64: 128, 256>}, {pipeline_mode = #tpu.pipeline_mode<synchronous>, transform_indices = @transform_4, window_bounds = array<i64: 128, 1>}, {pipeline_mode = #tpu.pipeline_mode<synchronous>, transform_indices = @transform_5, window_bounds = array<i64: 128, 1>}, {transform_indices = @transform_6, window_bounds = array<i64: 1, 1>}, {transform_indices = @transform_7, window_bounds = array<i64: 1, 128>}]} {
    %c0 = arith.constant 0 : index
    %c0_0 = arith.constant 0 : index
    %0 = vector.load %arg1[%c0, %c0_0] : memref<5x128xf32, #tpu.memory_space<vmem>>, vector<5x128xf32>
    %c0_1 = arith.constant 0 : index
    %c0_2 = arith.constant 0 : index
    %1 = vector.load %arg2[%c0_1, %c0_2] : memref<256x5xf32, #tpu.memory_space<vmem>>, vector<256x5xf32>
    %cst = arith.constant dense<0.000000e+00> : vector<256x128xf32>
    %2 = tpu.matmul %1, %0, %cst {dimension_numbers = #tpu.dot_dimension_numbers<[1], [0], [0], [1], [0, 0, 1, 1], [], []>} : vector<256x5xf32>, vector<5x128xf32>, vector<256x128xf32> -> vector<256x128xf32>
    %c0_3 = arith.constant 0 : index
    %c0_4 = arith.constant 0 : index
    %3 = vector.load %arg3[%c0_3, %c0_4] : memref<256x1xf32, #tpu.memory_space<vmem>>, vector<256x1xf32>
    %4 = vector.broadcast %3 : vector<256x1xf32> to vector<256x128xf32>
    %5 = arith.addf %2, %4 : vector<256x128xf32>
    %cst_5 = arith.constant 2.000000e-01 : f32
    %6 = vector.broadcast %cst_5 : f32 to vector<256x128xf32>
    %7 = arith.mulf %6, %5 : vector<256x128xf32>
    %8 = arith.maximumf %5, %7 : vector<256x128xf32>
    %c0_6 = arith.constant 0 : index
    %c0_7 = arith.constant 0 : index
    %9 = vector.load %arg4[%c0_6, %c0_7] : memref<128x256xf32, #tpu.memory_space<vmem>>, vector<128x256xf32>
    %cst_8 = arith.constant dense<0.000000e+00> : vector<128x128xf32>
    %10 = tpu.matmul %9, %8, %cst_8 {dimension_numbers = #tpu.dot_dimension_numbers<[1], [0], [0], [1], [0, 0, 1, 1], [], []>} : vector<128x256xf32>, vector<256x128xf32>, vector<128x128xf32> -> vector<128x128xf32>
    %c0_9 = arith.constant 0 : index
    %c0_10 = arith.constant 0 : index
    %11 = vector.load %arg5[%c0_9, %c0_10] : memref<128x1xf32, #tpu.memory_space<vmem>>, vector<128x1xf32>
    %12 = vector.broadcast %11 : vector<128x1xf32> to vector<128x128xf32>
    %13 = arith.addf %10, %12 : vector<128x128xf32>
    %cst_11 = arith.constant 2.000000e-01 : f32
    %14 = vector.broadcast %cst_11 : f32 to vector<128x128xf32>
    %15 = arith.mulf %14, %13 : vector<128x128xf32>
    %16 = arith.maximumf %13, %15 : vector<128x128xf32>
    %c0_12 = arith.constant 0 : index
    %c0_13 = arith.constant 0 : index
    %17 = vector.load %arg6[%c0_12, %c0_13] : memref<128x1xf32, #tpu.memory_space<vmem>>, vector<128x1xf32>
    %18 = vector.broadcast %17 : vector<128x1xf32> to vector<128x128xf32>
    %19 = arith.mulf %16, %18 : vector<128x128xf32>
    %cst_14 = arith.constant dense<0.000000e+00> : vector<128xf32>
    %20 = vector.multi_reduction <add>, %19, %cst_14 [0] : vector<128x128xf32> to vector<128xf32>
    %21 = vector.shape_cast %20 : vector<128xf32> to vector<1x128xf32>
    %c0_15 = arith.constant 0 : index
    %c0_16 = arith.constant 0 : index
    %22 = memref.load %arg7[%c0_15, %c0_16] : memref<1x1xf32, #tpu.memory_space<smem>>
    %23 = vector.broadcast %22 : f32 to vector<1x128xf32>
    %24 = arith.addf %21, %23 : vector<1x128xf32>
    %cst_17 = arith.constant 0.000000e+00 : f32
    %25 = vector.broadcast %cst_17 : f32 to vector<1x128xf32>
    %26 = arith.subf %25, %24 : vector<1x128xf32>
    %27 = math.exp %26 : vector<1x128xf32>
    %cst_18 = arith.constant 1.000000e+00 : f32
    %28 = vector.broadcast %cst_18 : f32 to vector<1x128xf32>
    %29 = arith.addf %28, %27 : vector<1x128xf32>
    %cst_19 = arith.constant 1.000000e+00 : f32
    %30 = vector.broadcast %cst_19 : f32 to vector<1x128xf32>
    %31 = arith.divf %30, %29 : vector<1x128xf32>
    %c0_20 = arith.constant 0 : index
    %c0_21 = arith.constant 0 : index
    %32 = vector.load %arg8[%c0_20, %c0_21] : memref<1x128xf32, #tpu.memory_space<vmem>>, vector<1x128xf32>
    tpu.vector_store %arg8[%c0_20, %c0_21], %31 {strides = array<i32>} : memref<1x128xf32, #tpu.memory_space<vmem>>, vector<1x128xf32>,
    return
  }
  func.func @transform_0(%arg0: i32) -> (i32, i32) {
    %c0_i32 = arith.constant 0 : i32
    %c0_i32_0 = arith.constant 0 : i32
    return %c0_i32, %arg0 : i32, i32
  }
  func.func @transform_1(%arg0: i32) -> (i32, i32) {
    %c0_i32 = arith.constant 0 : i32
    %c0_i32_0 = arith.constant 0 : i32
    %c0_i32_1 = arith.constant 0 : i32
    return %c0_i32, %c0_i32_0 : i32, i32
  }
  func.func @transform_2(%arg0: i32) -> (i32, i32) {
    %c0_i32 = arith.constant 0 : i32
    %c0_i32_0 = arith.constant 0 : i32
    %c0_i32_1 = arith.constant 0 : i32
    return %c0_i32, %c0_i32_0 : i32, i32
  }
  func.func @transform_3(%arg0: i32) -> (i32, i32) {
    %c0_i32 = arith.constant 0 : i32
    %c0_i32_0 = arith.constant 0 : i32
    %c0_i32_1 = arith.constant 0 : i32
    return %c0_i32, %c0_i32_0 : i32, i32
  }
  func.func @transform_4(%arg0: i32) -> (i32, i32) {
    %c0_i32 = arith.constant 0 : i32
    %c0_i32_0 = arith.constant 0 : i32
    %c0_i32_1 = arith.constant 0 : i32
    return %c0_i32, %c0_i32_0 : i32, i32
  }
  func.func @transform_5(%arg0: i32) -> (i32, i32) {
    %c0_i32 = arith.constant 0 : i32
    %c0_i32_0 = arith.constant 0 : i32
    %c0_i32_1 = arith.constant 0 : i32
    return %c0_i32, %c0_i32_0 : i32, i32
  }
  func.func @transform_6(%arg0: i32) -> (i32, i32) {
    %c0_i32 = arith.constant 0 : i32
    %c0_i32_0 = arith.constant 0 : i32
    %c0_i32_1 = arith.constant 0 : i32
    return %c0_i32, %c0_i32_0 : i32, i32
  }
  func.func @transform_7(%arg0: i32) -> (i32, i32) {
    %c0_i32 = arith.constant 0 : i32
    %c0_i32_0 = arith.constant 0 : i32
    return %c0_i32, %arg0 : i32, i32
  }
}

</mosaic_0001>

<bundles_post_ra>
// kernel: tpu_custom_call.1
= control target key start
LH: loop header
LB: loop body
LE: loop exit
PB: predicated region body
PF: predicated region fallthrough
CT: control target
= control target key end

     0   :  { %vm350_vm0 = vcmask 1044480   ;;  %v1363_v3 = vmov 0   ;;  %vm253_vm1 = vcmask 39936   ;;  %s1935_s0 = inlined_call_operand.vmem [shape: f32[5,128], index: 0, kind: input, shape index: {}]   ;;  %s1936_s1 = inlined_call_operand.vmem [shape: f32[256,5], index: 1, kind: input, shape index: {}]   ;;  %s1937_s2 = inlined_call_operand.vmem [shape: f32[256,1], index: 2, kind: input, shape index: {}]   ;;  %s1938_s3 = inlined_call_operand.vmem [shape: f32[128,256], index: 3, kind: input, shape index: {}]   ;;  %s1939_s4 = inlined_call_operand.vmem [shape: f32[128,1], index: 4, kind: input, shape index: {}]   ;;  %s1940_s5 = inlined_call_operand.vmem [shape: f32[128,1], index: 5, kind: input, shape index: {}]   ;;  %s1941_s6 = inlined_call_operand.<no memory space> [shape: f32[1,1], index: 6, kind: input, shape index: {}]   ;;  %s1942_s7 = inlined_call_operand.hbm [shape: f32[1,128], index: 7, kind: output, shape index: {}]  }
   0x1   :  { %v28_v0 = vld [vmem:[%s1935_s0] sm:$0x1f]  ;;  %v92_v1 = vld [vmem:[%s1937_s2 + $0xf8] sm:$0xff]  ;;  %v91_v2 = vld [vmem:[%s1937_s2 + $0xf0] sm:$0xff]  ;;  %1336 = vset.pattern.permute.xlu1 %v1363_v3  ;;  %1335 = vset.pattern.permute.xlu0 %v1363_v3 }
   0x2   :  { %v29_v4 = vld [vmem:[%s1936_s1] sm:$0xff]  ;;  %1251 = vmatprep.subr.msk.mxu0 %vm350_vm0, %v28_v0  ;;  %250 = vperm.xlu0 %1335, %v92_v1   ;;  %v30_v5 = vld [vmem:[%s1936_s1 + $0x8] sm:$0xff]  ;;  %v76_v6 = vld [vmem:[%s1937_s2 + $0x78] sm:$0xff] }
   0x3   :  { %245 = vperm.xlu1 %1336, %v91_v2   ;;  %1252 = vmatpush3.msk.msra.mxu0 %vm350_vm0, %v28_v0  ;;  %v31_v7 = vld [vmem:[%s1936_s1 + $0x10] sm:$0xff]  ;;  %v32_v9 = vld [vmem:[%s1936_s1 + $0x18] sm:$0xff]  ;;  %v90_v10 = vld [vmem:[%s1937_s2 + $0xe8] sm:$0xff] }
   0x4   :  { %1253 = vmatprep.mubr.msk.f32.mxu0 %vm253_vm1, %v29_v4  ;;  %v75_v8 = vld [vmem:[%s1937_s2 + $0x70] sm:$0xff]  ;;  %v33_v11 = vld [vmem:[%s1936_s1 + $0x20] sm:$0xff]  ;;  %v74_v12 = vld [vmem:[%s1937_s2 + $0x68] sm:$0xff] }
   0x5   :  { %1254 = vmatmul.mubr.msk.f32.vlgmr.msra.gmra.mxu0 %vm253_vm1, %v30_v5  ;;  %v34_v13 = vld [vmem:[%s1936_s1 + $0x28] sm:$0xff]  ;;  %v89_v14 = vld [vmem:[%s1937_s2 + $0xe0] sm:$0xff]  ;;  %v35_v15 = vld [vmem:[%s1936_s1 + $0x30] sm:$0xff] }
   0x6   :  { %170 = vperm.xlu0 %1335, %v76_v6   ;;  %1256 = vmatprep.mubr.msk.f32.mxu0 %vm253_vm1, %v31_v7  ;;  %v73_v16 = vld [vmem:[%s1937_s2 + $0x60] sm:$0xff]  ;;  %v36_v17 = vld [vmem:[%s1936_s1 + $0x38] sm:$0xff]  ;;  %v38_v21 = vld [vmem:[%s1936_s1 + $0x48] sm:$0xff] }
   0x7   :  { %165 = vperm.xlu1 %1336, %v75_v8   ;;  %v88_v18 = vld [vmem:[%s1937_s2 + $0xd8] sm:$0xff]  ;;  %v37_v19 = vld [vmem:[%s1936_s1 + $0x40] sm:$0xff]  ;;  %v87_v22 = vld [vmem:[%s1937_s2 + $0xd0] sm:$0xff] }
   0x8   :  { %v72_v20 = vld [vmem:[%s1937_s2 + $0x58] sm:$0xff]  ;;  %v39_v23 = vld [vmem:[%s1936_s1 + $0x50] sm:$0xff]  ;;  %v86_v26 = vld [vmem:[%s1937_s2 + $0xc8] sm:$0xff] }
   0x9   :  { %1257 = vmatmul.mubr.msk.f32.gmra.mxu0 %vm253_vm1, %v32_v9  ;;  %v71_v24 = vld [vmem:[%s1937_s2 + $0x50] sm:$0xff]  ;;  %v40_v25 = vld [vmem:[%s1936_s1 + $0x58] sm:$0xff]  ;;  %v41_v27 = vld [vmem:[%s1936_s1 + $0x60] sm:$0xff] }
   0xa   :  { %240 = vperm.xlu0 %1335, %v90_v10   ;;  %1259 = vmatprep.mubr.msk.f32.mxu0 %vm253_vm1, %v33_v11  ;;  %v70_v28 = vld [vmem:[%s1937_s2 + $0x48] sm:$0xff]  ;;  %v85_v30 = vld [vmem:[%s1937_s2 + $0xc0] sm:$0xff]  ;;  %v43_v31 = vld [vmem:[%s1936_s1 + $0x70] sm:$0xff] }
   0xb   :  { %160 = vperm.xlu1 %1336, %v74_v12   ;;  %v42_v29 = vld [vmem:[%s1936_s1 + $0x68] sm:$0xff]  ;;  %v69_v32 = vld [vmem:[%s1937_s2 + $0x40] sm:$0xff]  ;;  %v44_v33 = vld [vmem:[%s1936_s1 + $0x78] sm:$0xff] }
   0xc   :  { %v84_v34 = vld [vmem:[%s1937_s2 + $0xb8] sm:$0xff]  ;;  %v45_v35 = vld [vmem:[%s1936_s1 + $0x80] sm:$0xff] }
   0xd   :  { %1260 = vmatmul.mubr.msk.f32.gmra.mxu0 %vm253_vm1, %v34_v13  ;;  %v68_v36 = vld [vmem:[%s1937_s2 + $0x38] sm:$0xff] }
   0xe   :  { %235 = vperm.xlu0 %1335, %v89_v14   ;;  %1262 = vmatprep.mubr.msk.f32.mxu0 %vm253_vm1, %v35_v15 }
   0xf   :  { %155 = vperm.xlu1 %1336, %v73_v16  }
  0x11   :  { %1263 = vmatmul.mubr.msk.f32.gmra.mxu0 %vm253_vm1, %v36_v17 }
  0x12   :  { %230 = vperm.xlu0 %1335, %v88_v18   ;;  %1265 = vmatprep.mubr.msk.f32.mxu0 %vm253_vm1, %v37_v19 }
  0x13   :  { %150 = vperm.xlu1 %1336, %v72_v20  }
  0x15   :  { %1266 = vmatmul.mubr.msk.f32.gmra.mxu0 %vm253_vm1, %v38_v21 }
  0x16   :  { %225 = vperm.xlu0 %1335, %v87_v22   ;;  %1268 = vmatprep.mubr.msk.f32.mxu0 %vm253_vm1, %v39_v23 }
  0x17   :  { %145 = vperm.xlu1 %1336, %v71_v24  }
  0x19   :  { %1269 = vmatmul.mubr.msk.f32.gmra.mxu0 %vm253_vm1, %v40_v25 }
  0x1a   :  { %220 = vperm.xlu0 %1335, %v86_v26   ;;  %1271 = vmatprep.mubr.msk.f32.mxu0 %vm253_vm1, %v41_v27 }
  0x1b   :  { %140 = vperm.xlu1 %1336, %v70_v28  }
  0x1d   :  { %1272 = vmatmul.mubr.msk.f32.gmra.mxu0 %vm253_vm1, %v42_v29 }
  0x1e   :  { %215 = vperm.xlu0 %1335, %v85_v30   ;;  %1274 = vmatprep.mubr.msk.f32.mxu0 %vm253_vm1, %v43_v31 }
  0x1f   :  { %135 = vperm.xlu1 %1336, %v69_v32  }
  0x20   :  { %13 = vsyncpa [#allocation4], 0  ;;  %v46_v37 = vld [vmem:[%s1936_s1 + $0x88] sm:$0xff]  ;;  %v83_v38 = vld [vmem:[%s1937_s2 + $0xb0] sm:$0xff]  ;;  %s1364_s27 = smov [#allocation3]  }
  0x21   :  { %1275 = vmatmul.mubr.msk.f32.gmra.mxu0 %vm253_vm1, %v44_v33  ;;  %v47_v39 = vld [vmem:[%s1936_s1 + $0x90] sm:$0xff]  ;;  %v48_v41 = vld [vmem:[%s1936_s1 + $0x98] sm:$0xff]  ;;  %v82_v42 = vld [vmem:[%s1937_s2 + $0xa8] sm:$0xff]  ;;  %s1097_s28 = sshll.u32 %s1364_s27, 4  ;;  %s1098_s28 = int_to_ptr.vmem [resolvable:$true] %s1097_s28 }
  0x22   :  { %210 = vperm.xlu0 %1335, %v84_v34   ;;  %1277 = vmatprep.mubr.msk.f32.mxu0 %vm253_vm1, %v45_v35  ;;  %v67_v40 = vld [vmem:[%s1937_s2 + $0x30] sm:$0xff]  ;;  %v49_v43 = vld [vmem:[%s1936_s1 + $0xa0] sm:$0xff]  ;;  %v66_v44 = vld [vmem:[%s1937_s2 + $0x28] sm:$0xff]  ;;  %s1341_s29 = scalar_lea.vmem %s1098_s28, 16  ;;  %s1345_s30 = scalar_lea.vmem %s1098_s28, 32 }
  0x23   :  { %130 = vperm.xlu1 %1336, %v68_v36   ;;  %v50_v45 = vld [vmem:[%s1936_s1 + $0xa8] sm:$0xff]  ;;  %v81_v46 = vld [vmem:[%s1937_s2 + $0xa0] sm:$0xff]  ;;  %v51_v47 = vld [vmem:[%s1936_s1 + $0xb0] sm:$0xff]  ;;  %p1342_p0 = scmp.ne.s32.totalorder %s1098_s28, %s1341_s29  ;;  %p1346_p1 = scmp.lt.s32.totalorder %s1098_s28, %s1098_s28 }
  0x24   :  { %v65_v48 = vld [vmem:[%s1937_s2 + $0x20] sm:$0xff]  ;;  %v52_v49 = vld [vmem:[%s1936_s1 + $0xb8] sm:$0xff]  ;;  %v54_v53 = vld [vmem:[%s1936_s1 + $0xc8] sm:$0xff]  ;;  %p1347_p2 = scmp.lt.s32.totalorder %s1345_s30, %s1341_s29 }
  0x25   :  { %1278 = vmatmul.mubr.msk.f32.gmra.mxu0 %vm253_vm1, %v46_v37  ;;  %v80_v50 = vld [vmem:[%s1937_s2 + $0x98] sm:$0xff]  ;;  %v53_v51 = vld [vmem:[%s1936_s1 + $0xc0] sm:$0xff]  ;;  %v79_v54 = vld [vmem:[%s1937_s2 + $0x90] sm:$0xff] }
  0x26   :  { %205 = vperm.xlu0 %1335, %v83_v38   ;;  %1280 = vmatprep.mubr.msk.f32.mxu0 %vm253_vm1, %v47_v39  ;;  %v64_v52 = vld [vmem:[%s1937_s2 + $0x18] sm:$0xff]  ;;  %v55_v55 = vld [vmem:[%s1936_s1 + $0xd0] sm:$0xff]  ;;  %v78_v58 = vld [vmem:[%s1937_s2 + $0x88] sm:$0xff]  ;;  %p1348_p3 = por %p1347_p2, %p1346_p1 }
  0x27   :  { %125 = vperm.xlu1 %1336, %v67_v40   ;;  %v63_v56 = vld [vmem:[%s1937_s2 + $0x10] sm:$0xff]  ;;  %v56_v57 = vld [vmem:[%s1936_s1 + $0xd8] sm:$0xff]  ;;  %v57_v59 = vld [vmem:[%s1936_s1 + $0xe0] sm:$0xff] }
  0x28   :  { %v62_v60 = vld [vmem:[%s1937_s2 + $0x8] sm:$0xff]  ;;  %v77_v62 = vld [vmem:[%s1937_s2 + $0x80] sm:$0xff]  ;;  %v59_v63 = vld [vmem:[%s1936_s1 + $0xf0] sm:$0xff]  ;;  %p1349_p4 = pnand %p1348_p3, %p1342_p0 }
  0x29   :  { %1281 = vmatmul.mubr.msk.f32.gmra.mxu0 %vm253_vm1, %v48_v41  ;;  %v58_v61 = vld [vmem:[%s1936_s1 + $0xe8] sm:$0xff]  ;;  %v61_v0 = vld [vmem:[%s1937_s2] sm:$0xff]  ;;  %v60_v1 = vld [vmem:[%s1936_s1 + $0xf8] sm:$0xff] }
  0x2a   :  { %200 = vperm.xlu0 %1335, %v82_v42   ;;  %1283 = vmatprep.mubr.msk.f32.mxu0 %vm253_vm1, %v49_v43  ;;  %v675_v2 = vld [vmem:[%s1939_s4] sm:$0xff]  ;;  %v676_v3 = vld [vmem:[%s1939_s4 + $0x8] sm:$0xff]  ;;  %v677_v4 = vld [vmem:[%s1939_s4 + $0x10] sm:$0xff] }
  0x2b   :  { %120 = vperm.xlu1 %1336, %v66_v44   ;;  %v678_v5 = vld [vmem:[%s1939_s4 + $0x18] sm:$0xff]  ;;  %v679_v6 = vld [vmem:[%s1939_s4 + $0x20] sm:$0xff]  ;;  %v949_v8 = vld [vmem:[%s1940_s5 + $0x8] sm:$0xff] }
  0x2c   :  { %v948_v7 = vld [vmem:[%s1940_s5] sm:$0xff]  ;;  %v680_v9 = vld [vmem:[%s1939_s4 + $0x28] sm:$0xff]  ;;  %v950_v10 = vld [vmem:[%s1940_s5 + $0x10] sm:$0xff] }
  0x2d   :  { %1284 = vmatmul.mubr.msk.f32.gmra.mxu0 %vm253_vm1, %v50_v45  ;;  %v681_v11 = vld [vmem:[%s1939_s4 + $0x30] sm:$0xff]  ;;  %v951_v12 = vld [vmem:[%s1940_s5 + $0x18] sm:$0xff]  ;;  %v952_v14 = vld [vmem:[%s1940_s5 + $0x20] sm:$0xff] }
  0x2e   :  { %195 = vperm.xlu0 %1335, %v81_v46   ;;  %1286 = vmatprep.mubr.msk.f32.mxu0 %vm253_vm1, %v51_v47  ;;  %v682_v13 = vld [vmem:[%s1939_s4 + $0x38] sm:$0xff]  ;;  %v683_v15 = vld [vmem:[%s1939_s4 + $0x40] sm:$0xff]  ;;  %v953_v16 = vld [vmem:[%s1940_s5 + $0x28] sm:$0xff] }
  0x2f   :  { %115 = vperm.xlu1 %1336, %v65_v48   ;;  %v684_v17 = vld [vmem:[%s1939_s4 + $0x48] sm:$0xff]  ;;  %v954_v18 = vld [vmem:[%s1940_s5 + $0x30] sm:$0xff]  ;;  %v955_v20 = vld [vmem:[%s1940_s5 + $0x38] sm:$0xff] }
  0x30   :  { %v685_v19 = vld [vmem:[%s1939_s4 + $0x50] sm:$0xff]  ;;  %v686_v21 = vld [vmem:[%s1939_s4 + $0x58] sm:$0xff]  ;;  %v956_v22 = vld [vmem:[%s1940_s5 + $0x40] sm:$0xff] }
  0x31   :  { %1287 = vmatmul.mubr.msk.f32.gmra.mxu0 %vm253_vm1, %v52_v49  ;;  %v687_v23 = vld [vmem:[%s1939_s4 + $0x60] sm:$0xff]  ;;  %v957_v24 = vld [vmem:[%s1940_s5 + $0x48] sm:$0xff]  ;;  %v958_v26 = vld [vmem:[%s1940_s5 + $0x50] sm:$0xff] }
  0x32   :  { %190 = vperm.xlu0 %1335, %v80_v50   ;;  %1289 = vmatprep.mubr.msk.f32.mxu0 %vm253_vm1, %v53_v51  ;;  %v688_v25 = vld [vmem:[%s1939_s4 + $0x68] sm:$0xff]  ;;  %v689_v27 = vld [vmem:[%s1939_s4 + $0x70] sm:$0xff]  ;;  %v959_v28 = vld [vmem:[%s1940_s5 + $0x58] sm:$0xff] }
  0x33   :  { %110 = vperm.xlu1 %1336, %v64_v52   ;;  %v690_v29 = vld [vmem:[%s1939_s4 + $0x78] sm:$0xff]  ;;  %v960_v30 = vld [vmem:[%s1940_s5 + $0x60] sm:$0xff]  ;;  %v961_v31 = vld [vmem:[%s1940_s5 + $0x68] sm:$0xff] }
  0x34   :  { %v962_v32 = vld [vmem:[%s1940_s5 + $0x70] sm:$0xff]  ;;  %v963_v33 = vld [vmem:[%s1940_s5 + $0x78] sm:$0xff]  ;;  %v644_v34 = vld [vmem:[%s1938_s3 + $0x8] sm:$0xff] }
  0x35   :  { %1290 = vmatmul.mubr.msk.f32.gmra.mxu0 %vm253_vm1, %v54_v53  ;;  %v650_v35 = vld [vmem:[%s1938_s3 + $0x38] sm:$0xff] }
  0x36   :  { %185 = vperm.xlu0 %1335, %v79_v54   ;;  %1292 = vmatprep.mubr.msk.f32.mxu0 %vm253_vm1, %v55_v55 }
  0x37   :  { %105 = vperm.xlu1 %1336, %v63_v56   ;;  %850 = vmatprep.mubr.f32.mxu1 %v650_v35 }
  0x39   :  { %1293 = vmatmul.mubr.msk.f32.gmra.mxu0 %vm253_vm1, %v56_v57 }
  0x3a   :  { %180 = vperm.xlu0 %1335, %v78_v58   ;;  %1295 = vmatprep.mubr.msk.f32.mxu0 %vm253_vm1, %v57_v59 }
  0x3b   :  { %100 = vperm.xlu1 %1336, %v62_v60  }
  0x3d   :  { %1296 = vmatmul.mubr.msk.f32.gmra.mxu0 %vm253_vm1, %v58_v61 }
  0x3e   :  { %175 = vperm.xlu0 %1335, %v77_v62   ;;  %1298 = vmatprep.mubr.msk.f32.mxu0 %vm253_vm1, %v59_v63 }
  0x3f   :  { %95 = vperm.xlu1 %1336, %v61_v0  }
  0x41   :  { %1299 = vmatmul.mubr.msk.f32.gmra.mxu0 %vm253_vm1, %v60_v1 }
  0x42   :  { %693 = vperm.xlu0 %1335, %v675_v2   ;;  %835 = vmatprep.mubr.f32.mxu0 %v644_v34 }
  0x43   :  { %698 = vperm.xlu1 %1336, %v676_v3  }
  0x46   :  { %703 = vperm.xlu0 %1335, %v677_v4  }
  0x47   :  { %708 = vperm.xlu1 %1336, %v678_v5  }
  0x4a   :  { %713 = vperm.xlu0 %1335, %v679_v6  }
  0x4b   :  { %966 = vperm.xlu1 %1336, %v948_v7  }
  0x4e   :  { %971 = vperm.xlu0 %1335, %v949_v8  }
  0x4f   :  { %718 = vperm.xlu1 %1336, %v680_v9  }
  0x52   :  { %976 = vperm.xlu0 %1335, %v950_v10  }
  0x53   :  { %723 = vperm.xlu1 %1336, %v681_v11  }
  0x56   :  { %981 = vperm.xlu0 %1335, %v951_v12  }
  0x57   :  { %728 = vperm.xlu1 %1336, %v682_v13  }
  0x5a   :  { %986 = vperm.xlu0 %1335, %v952_v14  }
  0x5b   :  { %733 = vperm.xlu1 %1336, %v683_v15  }
  0x5e   :  { %991 = vperm.xlu0 %1335, %v953_v16  }
  0x5f   :  { %738 = vperm.xlu1 %1336, %v684_v17  }
  0x62   :  { %996 = vperm.xlu0 %1335, %v954_v18  }
  0x63   :  { %743 = vperm.xlu1 %1336, %v685_v19  }
  0x66   :  { %1001 = vperm.xlu0 %1335, %v955_v20  }
  0x67   :  { %748 = vperm.xlu1 %1336, %v686_v21  }
  0x6a   :  { %1006 = vperm.xlu0 %1335, %v956_v22  }
  0x6b   :  { %753 = vperm.xlu1 %1336, %v687_v23  }
  0x6e   :  { %1011 = vperm.xlu0 %1335, %v957_v24  }
  0x6f   :  { %758 = vperm.xlu1 %1336, %v688_v25  }
  0x72   :  { %1016 = vperm.xlu0 %1335, %v958_v26  }
  0x73   :  { %763 = vperm.xlu1 %1336, %v689_v27  }
  0x76   :  { %1021 = vperm.xlu0 %1335, %v959_v28  }
  0x77   :  { %768 = vperm.xlu1 %1336, %v690_v29  }
  0x7a   :  { %1026 = vperm.xlu0 %1335, %v960_v30  }
  0x7b   :  { %1031 = vperm.xlu1 %1336, %v961_v31  }
  0x7d   :  { %v251_v36 = vpop.permute.xlu0 %250 }
  0x7e   :  { %1036 = vperm.xlu0 %1335, %v962_v32   ;;  %v1734_v37 = vpop.permute.xlu1 %245 }
  0x7f   :  { %1041 = vperm.xlu1 %1336, %v963_v33  }
  0x81   :  { %v171_v39 = vpop.permute.xlu0 %170 }
  0x82   :  { %v166_v41 = vpop.permute.xlu1 %165 }
  0x85   :  { %v241_v44 = vpop.permute.xlu0 %240 }
  0x86   :  { %v161_v46 = vpop.permute.xlu1 %160 }
  0x89   :  { %v236_v49 = vpop.permute.xlu0 %235 }
  0x8a   :  { %v156_v51 = vpop.permute.xlu1 %155 }
  0x8d   :  { %v231_v54 = vpop.permute.xlu0 %230 }
  0x8e   :  { %v151_v56 = vpop.permute.xlu1 %150 }
  0x91   :  { %v226_v59 = vpop.permute.xlu0 %225 }
  0x92   :  { %v146_v61 = vpop.permute.xlu1 %145 }
  0x95   :  { %v221_v0 = vpop.permute.xlu0 %220 }
  0x96   :  { %v141_v2 = vpop.permute.xlu1 %140 }
  0x99   :  { %v1762_v5 = vpop.permute.xlu0 %215 }
  0x9a   :  { %v1766_v7 = vpop.permute.xlu1 %135 }
  0x9d   :  { %v1772_v10 = vpop.permute.xlu0 %210 }
  0x9e   :  { %v1776_v12 = vpop.permute.xlu1 %130 }
  0xa1   :  { %v1780_v15 = vpop.permute.xlu0 %205 }
  0xa2   :  { %v1782_v17 = vpop.permute.xlu1 %125 }
  0xa5   :  { %v1784_v20 = vpop.permute.xlu0 %200 }
  0xa6   :  { %v1786_v22 = vpop.permute.xlu1 %120 }
  0xa9   :  { %v1788_v29 = vpop.permute.xlu0 %195 }
  0xaa   :  { %v1790_v33 = vpop.permute.xlu1 %115 }
  0xc5   :  { %v1736_v38 = vpop.f32.mrf.mxu0 }
  0xc6   :  { %1943 = vst [vmem:[#allocation6_spill] sm:$0xff] %v1736_v38 }
  0xc7   :  { %v1738_v40 = vpop.f32.mrf.mxu0 }
  0xc8   :  { %1944 = vst [vmem:[#allocation7_spill] sm:$0xff] %v1738_v40 }
  0xc9   :  { %v1740_v42 = vpop.f32.mrf.mxu0 }
  0xcb   :  { %v1742_v43 = vpop.f32.mrf.mxu0 }
  0xcc   :  { %1945 = vst [vmem:[#allocation8_spill] sm:$0xff] %v1742_v43 }
  0xcd   :  { %v1744_v45 = vpop.f32.mrf.mxu0 }
  0xcf   :  { %v1746_v47 = vpop.f32.mrf.mxu0 }
  0xd1   :  { %v1748_v48 = vpop.f32.mrf.mxu0 }
  0xd3   :  { %v1750_v50 = vpop.f32.mrf.mxu0 }
  0xd5   :  { %v1752_v52 = vpop.f32.mrf.mxu0 }
  0xd7   :  { %v1754_v53 = vpop.f32.mrf.mxu0 }
  0xd9   :  { %v1270_v55 = vpop.f32.mrf.mxu0 }
  0xdb   :  { %v470_v57 = vpop.f32.mrf.mxu0 }
  0xdd   :  { %v1273_v58 = vpop.f32.mrf.mxu0 }
  0xde   :  { %v486_v30 = vadd.f32 %v1273_v58, %v161_v46  ;;  %v1793_v58 = vpop.permute.xlu0 %190 }
  0xdf   :  { %v480_v60 = vpop.f32.mrf.mxu0 }
  0xe1   :  { %v1276_v62 = vpop.f32.mrf.mxu0 }
  0xe2   :  { %v496_v23 = vadd.f32 %v1276_v62, %v171_v39 }
  0xe3   :  { %v490_v63 = vpop.f32.mrf.mxu0 }
  0xe4   :  { %v491_v25 = vadd.f32 %v490_v63, %v166_v41  ;;  %v594_v31 = vmul.f32 0.2, %v496_v23  ;;  %v476_v63 = vadd.f32 %v1270_v55, %v151_v56  ;;  %v466_v55 = vadd.f32 %v1752_v52, %v141_v2 }
  0xe5   :  { %v1756_v1 = vpop.f32.mrf.mxu0 }
  0xe6   :  { %1946 = vst [vmem:[#allocation9_spill] sm:$0xff] %v1756_v1  ;;  %v593_v38 = vmul.f32 0.2, %v491_v25  ;;  %v590_v56 = vmul.f32 0.2, %v476_v63 }
  0xe7   :  { %v1758_v3 = vpop.f32.mrf.mxu0 }
  0xe8   :  { %1947 = vst [vmem:[#allocation10_spill] sm:$0xff] %v1758_v3  ;;  %v481_v3 = vadd.f32 %v480_v60, %v156_v51  ;;  %v625_v43 = vmax.f32 %v491_v25, %v593_v38  ;;  %v461_v38 = vadd.f32 %v1754_v53, %v1766_v7 }
  0xe9   :  { %v1760_v4 = vpop.f32.mrf.mxu0 }
  0xeb   :  { %v1764_v6 = vpop.f32.mrf.mxu0 }
  0xed   :  { %v1768_v8 = vpop.f32.mrf.mxu0 }
  0xef   :  { %v1770_v9 = vpop.f32.mrf.mxu0 }
  0xf1   :  { %v1774_v11 = vpop.f32.mrf.mxu0 }
  0xf2   :  { %v536_v52 = vadd.f32 %v1774_v11, %v1772_v10  ;;  %v587_v10 = vmul.f32 0.2, %v461_v38 }
  0xf3   :  { %v1778_v13 = vpop.f32.mrf.mxu0 }
  0xf5   :  { %v1291_v14 = vpop.f32.mrf.mxu0 }
  0xf6   :  { %v546_v51 = vadd.f32 %v1291_v14, %v221_v0 }
  0xf7   :  { %v540_v16 = vpop.f32.mrf.mxu0 }
  0xf8   :  { %v604_v2 = vmul.f32 0.2, %v546_v51 }
  0xf9   :  { %v1294_v18 = vpop.f32.mrf.mxu0 }
  0xfa   :  { %v556_v1 = vadd.f32 %v1294_v18, %v231_v54  ;;  %v636_v25 = vmax.f32 %v546_v51, %v604_v2 }
  0xfb   :  { %v550_v19 = vpop.f32.mrf.mxu0 }
  0xfc   :  { %v606_v54 = vmul.f32 0.2, %v556_v1 }
  0xfd   :  { %v1297_v21 = vpop.f32.mrf.mxu0 }
  0xfe   :  { %v566_v27 = vadd.f32 %v1297_v21, %v241_v44  ;;  %v592_v44 = vmul.f32 0.2, %v486_v30  ;;  %v551_v21 = vadd.f32 %v550_v19, %v226_v59  ;;  %v541_v59 = vadd.f32 %v540_v16, %v1762_v5 }
  0xff   :  { %v560_v24 = vpop.f32.mrf.mxu0  ;;  %v638_v18 = vmax.f32 %v556_v1, %v606_v54  ;;  %v456_v5 = vadd.f32 %v1748_v48, %v1776_v12  ;;  %v588_v16 = vmul.f32 0.2, %v466_v55  ;;  %v622_v19 = vmax.f32 %v476_v63, %v590_v56 }
 0x100   :  { %v561_v34 = vadd.f32 %v560_v24, %v236_v49  ;;  %v608_v39 = vmul.f32 0.2, %v566_v27  ;;  %v471_v49 = vadd.f32 %v470_v57, %v146_v61  ;;  %v591_v24 = vmul.f32 0.2, %v481_v3 }
 0x101   :  { %v1300_v26 = vpop.f32.mrf.mxu0  ;;  %v605_v57 = vmul.f32 0.2, %v551_v21  ;;  %v603_v7 = vmul.f32 0.2, %v541_v59  ;;  %v451_v1 = vadd.f32 %v1750_v50, %v1782_v17  ;;  %v526_v48 = vadd.f32 %v1768_v8, %v1784_v20 }
 0x102   :  { %v576_v28 = vadd.f32 %v1300_v26, %v251_v36  ;;  %v626_v36 = vmax.f32 %v496_v23, %v594_v31  ;;  %v607_v26 = vmul.f32 0.2, %v561_v34  ;;  %v640_v60 = vmax.f32 %v566_v27, %v608_v39 }
 0x103   :  { %v570_v32 = vpop.f32.mrf.mxu0  ;;  %v589_v0 = vmul.f32 0.2, %v471_v49  ;;  %v623_v14 = vmax.f32 %v481_v3, %v591_v24  ;;  %v531_v3 = vadd.f32 %v1778_v13, %v1780_v15  ;;  %v637_v23 = vmax.f32 %v551_v21, %v605_v57 }
 0x104   :  { %v610_v35 = vmul.f32 0.2, %v576_v28  ;;  %v571_v40 = vadd.f32 %v570_v32, %v1734_v37  ;;  %v1795_v37 = vpop.permute.xlu1 %110  ;;  %v639_v61 = vmax.f32 %v561_v34, %v607_v26  ;;  %v602_v12 = vmul.f32 0.2, %v536_v52 }
 0x105   :  { %v621_v11 = vmax.f32 %v471_v49, %v589_v0  ;;  %v446_v13 = vadd.f32 %v1744_v45, %v1786_v22  ;;  %v586_v15 = vmul.f32 0.2, %v456_v5  ;;  %v620_v27 = vmax.f32 %v466_v55, %v588_v16  ;;  %v1952_v55 = vld [vmem:[#allocation7_spill] sm:$0xff] }
 0x106   :  { %v642_v62 = vmax.f32 %v576_v28, %v610_v35  ;;  %v609_v41 = vmul.f32 0.2, %v571_v40  ;;  %v521_v50 = vadd.f32 %v1770_v9, %v1788_v29  ;;  %v601_v17 = vmul.f32 0.2, %v531_v3 }
 0x107   :  { %v635_v28 = vmax.f32 %v541_v59, %v603_v7  ;;  %v441_v8 = vadd.f32 %v1746_v47, %v1790_v33  ;;  %v585_v20 = vmul.f32 0.2, %v451_v1  ;;  %v619_v31 = vmax.f32 %v461_v38, %v587_v10  ;;  %v646_v7 = vld [vmem:[%s1938_s3 + $0x18] sm:$0xff]  ;;  %v651_v10 = vld [vmem:[%s1938_s3 + $0x40] sm:$0xff] }
 0x108   :  { %v641_v46 = vmax.f32 %v571_v40, %v609_v41  ;;  %1171 = vmatprep.subr.mxu0 %v642_v62  ;;  %1301 = vmatprep.subr.mxu1 %v642_v62  ;;  %v624_v40 = vmax.f32 %v486_v30, %v592_v44  ;;  %v106_v53 = vpop.permute.xlu1 %105  ;;  %v516_v22 = vadd.f32 %v1760_v4, %v1793_v58  ;;  %v600_v32 = vmul.f32 0.2, %v526_v48  ;;  %v1948_v62 = vld [vmem:[#allocation8_spill] sm:$0xff]  ;;  %v1949_v44 = vld [vmem:[#allocation9_spill] sm:$0xff] }
 0x109   :  { %1172 = vmatpush3.msra.mxu0 %v626_v36  ;;  %1317 = vmatpush3.msra.mxu1 %v626_v36  ;;  %v634_v34 = vmax.f32 %v536_v52, %v602_v12  ;;  %v436_v9 = vadd.f32 %v1740_v42, %v1795_v37  ;;  %v584_v29 = vmul.f32 0.2, %v446_v13  ;;  %v618_v35 = vmax.f32 %v456_v5, %v586_v15  ;;  %v1951_v37 = vld [vmem:[#allocation10_spill] sm:$0xff] }
 0x10a   :  { %1173 = vmatprep.subr.mxu0 %v641_v46  ;;  %1302 = vmatprep.subr.mxu1 %v641_v46  ;;  %v599_v33 = vmul.f32 0.2, %v521_v50  ;;  %v633_v39 = vmax.f32 %v531_v3, %v601_v17  ;;  %v431_v41 = vadd.f32 %v1948_v62, %v106_v53  ;;  %v583_v4 = vmul.f32 0.2, %v441_v8  ;;  %v1950_v46 = vld [vmem:[#allocation6_spill] sm:$0xff]  ;;  %v649_v3 = vld [vmem:[%s1938_s3 + $0x30] sm:$0xff] }
 0x10b   :  { %1174 = vmatpush3.msra.mxu0 %v625_v43  ;;  %1318 = vmatpush3.msra.mxu1 %v625_v43  ;;  %v186_v43 = vpop.permute.xlu0 %185  ;;  %v617_v63 = vmax.f32 %v451_v1, %v585_v20  ;;  %v598_v21 = vmul.f32 0.2, %v516_v22  ;;  %v632_v42 = vmax.f32 %v526_v48, %v600_v32  ;;  %v616_v49 = vmax.f32 %v446_v13, %v584_v29  ;;  %v643_v53 = vld [vmem:[%s1938_s3] sm:$0xff]  ;;  %v645_v1 = vld [vmem:[%s1938_s3 + $0x10] sm:$0xff]  ;;  %v654_v48 = vld [vmem:[%s1938_s3 + $0x58] sm:$0xff] }
 0x10c   :  { %1175 = vmatprep.subr.mxu0 %v640_v60  ;;  %1303 = vmatprep.subr.mxu1 %v640_v60  ;;  %v101_v45 = vpop.permute.xlu1 %100  ;;  %v511_v47 = vadd.f32 %v1764_v6, %v186_v43  ;;  %v582_v6 = vmul.f32 0.2, %v436_v9  ;;  %v631_v60 = vmax.f32 %v521_v50, %v599_v33  ;;  %v615_v59 = vmax.f32 %v441_v8, %v583_v4  ;;  %v647_v12 = vld [vmem:[%s1938_s3 + $0x20] sm:$0xff]  ;;  %v656_v13 = vld [vmem:[%s1938_s3 + $0x68] sm:$0xff]  ;;  %v657_v50 = vld [vmem:[%s1938_s3 + $0x70] sm:$0xff] }
 0x10d   :  { %1176 = vmatpush3.msra.mxu0 %v624_v40  ;;  %1319 = vmatpush3.msra.mxu1 %v624_v40  ;;  %v426_v58 = vadd.f32 %v1950_v46, %v101_v45  ;;  %v581_v40 = vmul.f32 0.2, %v431_v41  ;;  %v655_v15 = vld [vmem:[%s1938_s3 + $0x60] sm:$0xff]  ;;  %v660_v17 = vld [vmem:[%s1938_s3 + $0x88] sm:$0xff]  ;;  %v661_v8 = vld [vmem:[%s1938_s3 + $0x90] sm:$0xff] }
 0x10e   :  { %1177 = vmatprep.subr.mxu0 %v639_v61  ;;  %1304 = vmatprep.subr.mxu1 %v639_v61  ;;  %v597_v54 = vmul.f32 0.2, %v511_v47  ;;  %v630_v61 = vmax.f32 %v516_v22, %v598_v21  ;;  %v614_v0 = vmax.f32 %v436_v9, %v582_v6  ;;  %v664_v20 = vld [vmem:[%s1938_s3 + $0xa8] sm:$0xff]  ;;  %v666_v45 = vld [vmem:[%s1938_s3 + $0xb8] sm:$0xff]  ;;  %v665_v22 = vld [vmem:[%s1938_s3 + $0xb0] sm:$0xff] }
 0x10f   :  { %1178 = vmatpush3.msra.mxu0 %v623_v14  ;;  %1320 = vmatpush3.msra.mxu1 %v623_v14  ;;  %v181_v30 = vpop.permute.xlu0 %180  ;;  %v580_v38 = vmul.f32 0.2, %v426_v58  ;;  %v668_v32 = vld [vmem:[%s1938_s3 + $0xc8] sm:$0xff]  ;;  %v670_v9 = vld [vmem:[%s1938_s3 + $0xd8] sm:$0xff]  ;;  %v669_v29 = vld [vmem:[%s1938_s3 + $0xd0] sm:$0xff] }
 0x110   :  { %1179 = vmatprep.subr.mxu0 %v638_v18  ;;  %1305 = vmatprep.subr.mxu1 %v638_v18  ;;  %v506_v36 = vadd.f32 %v1949_v44, %v181_v30  ;;  %v96_v24 = vpop.permute.xlu1 %95  ;;  %v629_v52 = vmax.f32 %v511_v47, %v597_v54  ;;  %v613_v18 = vmax.f32 %v431_v41, %v581_v40  ;;  %v662_v30 = vld [vmem:[%s1938_s3 + $0x98] sm:$0xff]  ;;  %v671_v47 = vld [vmem:[%s1938_s3 + $0xe0] sm:$0xff] }
 0x111   :  { %1180 = vmatpush3.msra.mxu0 %v622_v19  ;;  %1321 = vmatpush3.msra.mxu1 %v622_v19  ;;  %v421_v56 = vadd.f32 %v1952_v55, %v96_v24  ;;  %v612_v5 = vmax.f32 %v426_v58, %v580_v38  ;;  %v674_v33 = vld [vmem:[%s1938_s3 + $0xf8] sm:$0xff] }
 0x112   :  { %1181 = vmatprep.subr.mxu0 %v637_v23  ;;  %1306 = vmatprep.subr.mxu1 %v637_v23  ;;  %v596_v57 = vmul.f32 0.2, %v506_v36  ;;  %v652_v23 = vld [vmem:[%s1938_s3 + $0x48] sm:$0xff] }
 0x113   :  { %1182 = vmatpush3.msra.mxu0 %v621_v11  ;;  %1322 = vmatpush3.msra.mxu1 %v621_v11  ;;  %v176_v26 = vpop.permute.xlu0 %175  ;;  %v579_v2 = vmul.f32 0.2, %v421_v56  ;;  %v648_v11 = vld [vmem:[%s1938_s3 + $0x28] sm:$0xff] }
 0x114   :  { %1183 = vmatprep.subr.mxu0 %v636_v25  ;;  %1307 = vmatprep.subr.mxu1 %v636_v25  ;;  %v501_v51 = vadd.f32 %v1951_v37, %v176_v26  ;;  %v628_v43 = vmax.f32 %v506_v36, %v596_v57  ;;  %v653_v25 = vld [vmem:[%s1938_s3 + $0x50] sm:$0xff]  ;;  %v699_v41 = vpop.permute.xlu1 %698 }
 0x115   :  { %1184 = vmatpush3.msra.mxu0 %v620_v27  ;;  %1323 = vmatpush3.msra.mxu1 %v620_v27  ;;  %v611_v19 = vmax.f32 %v421_v56, %v579_v2  ;;  %v658_v27 = vld [vmem:[%s1938_s3 + $0x78] sm:$0xff] }
 0x116   :  { %1185 = vmatprep.subr.mxu0 %v635_v28  ;;  %1308 = vmatprep.subr.mxu1 %v635_v28  ;;  %v595_v14 = vmul.f32 0.2, %v501_v51  ;;  %v659_v28 = vld [vmem:[%s1938_s3 + $0x80] sm:$0xff] }
 0x117   :  { %1186 = vmatpush3.msra.mxu0 %v619_v31  ;;  %1324 = vmatpush3.msra.mxu1 %v619_v31  ;;  %v663_v31 = vld [vmem:[%s1938_s3 + $0xa0] sm:$0xff]  ;;  %v694_v62 = vpop.permute.xlu0 %693 }
 0x118   :  { %1187 = vmatprep.subr.mxu0 %v634_v34  ;;  %1309 = vmatprep.subr.mxu1 %v634_v34  ;;  %v627_v16 = vmax.f32 %v501_v51, %v595_v14  ;;  %v667_v34 = vld [vmem:[%s1938_s3 + $0xc0] sm:$0xff] }
 0x119   :  { %1188 = vmatpush3.msra.mxu0 %v618_v35  ;;  %1325 = vmatpush3.msra.mxu1 %v618_v35  ;;  %v672_v35 = vld [vmem:[%s1938_s3 + $0xe8] sm:$0xff] }
 0x11a   :  { %1189 = vmatprep.subr.mxu0 %v633_v39  ;;  %1310 = vmatprep.subr.mxu1 %v633_v39  ;;  %v673_v39 = vld [vmem:[%s1938_s3 + $0xf0] sm:$0xff] }
 0x11b   :  { %1190 = vmatpush3.msra.mxu0 %v617_v63  ;;  %1326 = vmatpush3.msra.mxu1 %v617_v63  ;;  %v704_v4 = vpop.permute.xlu0 %703  ;;  %v709_v63 = vpop.permute.xlu1 %708 }
 0x11c   :  { %1191 = vmatprep.subr.mxu0 %v632_v42  ;;  %1311 = vmatprep.subr.mxu1 %v632_v42 }
 0x11d   :  { %1192 = vmatpush3.msra.mxu0 %v616_v49  ;;  %1327 = vmatpush3.msra.mxu1 %v616_v49 }
 0x11e   :  { %1193 = vmatprep.subr.mxu0 %v631_v60  ;;  %1312 = vmatprep.subr.mxu1 %v631_v60 }
 0x11f   :  { %1194 = vmatpush3.msra.mxu0 %v615_v59  ;;  %1328 = vmatpush3.msra.mxu1 %v615_v59  ;;  %v714_v44 = vpop.permute.xlu0 %713  ;;  %v967_v36 = vpop.permute.xlu1 %966 }
 0x120   :  { %1195 = vmatprep.subr.mxu0 %v630_v61  ;;  %1313 = vmatprep.subr.mxu1 %v630_v61 }
 0x121   :  { %1196 = vmatpush3.msra.mxu0 %v614_v0  ;;  %1329 = vmatpush3.msra.mxu1 %v614_v0 }
 0x122   :  { %1197 = vmatprep.subr.mxu0 %v629_v52  ;;  %1314 = vmatprep.subr.mxu1 %v629_v52 }
 0x123   :  { %1198 = vmatpush3.msra.mxu0 %v613_v18  ;;  %1330 = vmatpush3.msra.mxu1 %v613_v18  ;;  %v972_v21 = vpop.permute.xlu0 %971  ;;  %v719_v42 = vpop.permute.xlu1 %718 }
 0x124   :  { %1199 = vmatprep.subr.mxu0 %v628_v43  ;;  %1315 = vmatprep.subr.mxu1 %v628_v43 }
 0x125   :  { %1200 = vmatpush3.msra.mxu0 %v612_v5  ;;  %1331 = vmatpush3.msra.mxu1 %v612_v5 }
 0x126   :  { %1201 = vmatprep.subr.mxu0 %v627_v16  ;;  %1316 = vmatprep.subr.mxu1 %v627_v16 }
 0x127   :  { %1202 = vmatpush3.msra.mxu0 %v611_v19  ;;  %1332 = vmatpush3.msra.mxu1 %v611_v19  ;;  %v977_v26 = vpop.permute.xlu0 %976  ;;  %v724_v46 = vpop.permute.xlu1 %723 }
 0x128   :  { %836 = vmatmul.mubr.f32.vlgmr.msra.gmra.mxu0 %v643_v53  ;;  %851 = vmatmul.mubr.f32.vlgmr.msra.gmra.mxu1 %v649_v3 }
 0x129   :  { %840 = vmatprep.mubr.f32.mxu0 %v646_v7  ;;  %855 = vmatprep.mubr.f32.mxu1 %v652_v23 }
 0x12b   :  { %v982_v58 = vpop.permute.xlu0 %981  ;;  %v1917_v6 = vpop.permute.xlu1 %728 }
 0x12c   :  { %841 = vmatmul.mubr.f32.gmra.mxu0 %v645_v1  ;;  %856 = vmatmul.mubr.f32.gmra.mxu1 %v651_v10 }
 0x12d   :  { %845 = vmatprep.mubr.f32.mxu0 %v648_v11  ;;  %860 = vmatprep.mubr.f32.mxu1 %v654_v48 }
 0x12f   :  { %v1919_v49 = vpop.permute.xlu0 %986  ;;  %v1921_v60 = vpop.permute.xlu1 %733 }
 0x130   :  { %846 = vmatmul.mubr.f32.gmra.mxu0 %v647_v12  ;;  %861 = vmatmul.mubr.f32.gmra.mxu1 %v653_v25 }
 0x131   :  { %865 = vmatprep.mubr.f32.mxu1 %v656_v13 }
 0x133   :  { %v1923_v59 = vpop.permute.xlu0 %991  ;;  %v739_v18 = vpop.permute.xlu1 %738 }
 0x134   :  { %866 = vmatmul.mubr.f32.gmra.mxu1 %v655_v15 }
 0x135   :  { %870 = vmatprep.mubr.f32.mxu1 %v658_v27 }
 0x137   :  { %v997_v23 = vpop.permute.xlu0 %996  ;;  %v744_v27 = vpop.permute.xlu1 %743 }
 0x138   :  { %871 = vmatmul.mubr.f32.gmra.mxu1 %v657_v50 }
 0x139   :  { %875 = vmatprep.mubr.f32.mxu1 %v660_v17 }
 0x13c   :  { %876 = vmatmul.mubr.f32.gmra.mxu1 %v659_v28 }
 0x13d   :  { %880 = vmatprep.mubr.f32.mxu1 %v662_v30 }
 0x140   :  { %881 = vmatmul.mubr.f32.gmra.mxu1 %v661_v8  ;;  %v1002_v8 = vpop.permute.xlu0 %1001 }
 0x141   :  { %885 = vmatprep.mubr.f32.mxu1 %v664_v20 }
 0x144   :  { %886 = vmatmul.mubr.f32.gmra.mxu1 %v663_v31 }
 0x145   :  { %890 = vmatprep.mubr.f32.mxu1 %v666_v45 }
 0x148   :  { %891 = vmatmul.mubr.f32.gmra.mxu1 %v665_v22 }
 0x149   :  { %895 = vmatprep.mubr.f32.mxu1 %v668_v32 }
 0x14c   :  { %896 = vmatmul.mubr.f32.gmra.mxu1 %v667_v34 }
 0x14d   :  { %900 = vmatprep.mubr.f32.mxu1 %v670_v9 }
 0x150   :  { %901 = vmatmul.mubr.f32.gmra.mxu1 %v669_v29 }
 0x151   :  { %905 = vmatprep.mubr.f32.mxu1 %v672_v35 }
 0x154   :  { %906 = vmatmul.mubr.f32.gmra.mxu1 %v671_v47 }
 0x155   :  { %910 = vmatprep.mubr.f32.mxu1 %v674_v33  ;;  %v749_v33 = vpop.permute.xlu1 %748 }
 0x158   :  { %911 = vmatmul.mubr.f32.gmra.mxu1 %v673_v39 }
 0x1e8   :  { %v1203_v24 = vpop.f32.mrf.mxu0  ;;  %v1212_v37 = vpop.f32.mrf.mxu1 }
 0x1ea   :  { %v1204_v51 = vpop.f32.mrf.mxu0  ;;  %v1213_v54 = vpop.f32.mrf.mxu1 }
 0x1eb   :  { %v1205_v55 = vadd.f32 %v1204_v51, %v1203_v24  ;;  %v1214_v0 = vadd.f32 %v1213_v54, %v1212_v37 }
 0x1ec   :  { %v1206_v56 = vpop.f32.mrf.mxu0  ;;  %v1215_v40 = vpop.f32.mrf.mxu1 }
 0x1ed   :  { %v838_v57 = vadd.f32 %v1205_v55, %v694_v62  ;;  %v853_v53 = vadd.f32 %v1214_v0, %v709_v63  ;;  %v754_v55 = vpop.permute.xlu1 %753 }
 0x1ee   :  { %v1207_v61 = vpop.f32.mrf.mxu0  ;;  %v1216_v38 = vpop.f32.mrf.mxu1 }
 0x1ef   :  { %v1208_v14 = vadd.f32 %v1207_v61, %v1206_v56  ;;  %v916_v5 = vmul.f32 0.2, %v838_v57  ;;  %v1217_v7 = vadd.f32 %v1216_v38, %v1215_v40  ;;  %v919_v13 = vmul.f32 0.2, %v853_v53 }
 0x1f0   :  { %v1209_v52 = vpop.f32.mrf.mxu0  ;;  %v1218_v2 = vpop.f32.mrf.mxu1 }
 0x1f1   :  { %v843_v43 = vadd.f32 %v1208_v14, %v699_v41  ;;  %v932_v48 = vmax.f32 %v838_v57, %v916_v5  ;;  %v858_v15 = vadd.f32 %v1217_v7, %v714_v44  ;;  %v935_v22 = vmax.f32 %v853_v53, %v919_v13 }
 0x1f2   :  { %v1210_v16 = vpop.f32.mrf.mxu0  ;;  %v1219_v19 = vpop.f32.mrf.mxu1 }
 0x1f3   :  { %v917_v3 = vmul.f32 0.2, %v843_v43  ;;  %v1211_v1 = vadd.f32 %v1210_v16, %v1209_v52  ;;  %v1220_v28 = vadd.f32 %v1219_v19, %v1218_v2  ;;  %v1044_v20 = vmul.f32 %v967_v36, %v932_v48  ;;  %v759_v19 = vpop.permute.xlu1 %758 }
 0x1f4   :  { %v1221_v10 = vpop.f32.mrf.mxu1  ;;  %v920_v32 = vmul.f32 0.2, %v858_v15  ;;  %v1047_v41 = vmul.f32 %v982_v58, %v935_v22 }
 0x1f5   :  { %v933_v11 = vmax.f32 %v843_v43, %v917_v3  ;;  %v848_v12 = vadd.f32 %v1211_v1, %v704_v4  ;;  %v863_v29 = vadd.f32 %v1220_v28, %v719_v42  ;;  %v1007_v4 = vpop.permute.xlu0 %1006 }
 0x1f6   :  { %v1222_v25 = vpop.f32.mrf.mxu1  ;;  %v936_v63 = vmax.f32 %v858_v15, %v920_v32 }
 0x1f7   :  { %v1045_v50 = vmul.f32 %v972_v21, %v933_v11  ;;  %v918_v17 = vmul.f32 0.2, %v848_v12  ;;  %v1223_v35 = vadd.f32 %v1222_v25, %v1221_v10  ;;  %v921_v44 = vmul.f32 0.2, %v863_v29 }
 0x1f8   :  { %v1224_v30 = vpop.f32.mrf.mxu1  ;;  %v1048_v56 = vmul.f32 %v1919_v49, %v936_v63 }
 0x1f9   :  { %v934_v31 = vmax.f32 %v848_v12, %v918_v17  ;;  %v1060_v34 = vadd.f32 %v1045_v50, %v1044_v20  ;;  %v868_v21 = vadd.f32 %v1223_v35, %v724_v46  ;;  %v1012_v38 = vpop.permute.xlu0 %1011  ;;  %v764_v17 = vpop.permute.xlu1 %763 }
 0x1fa   :  { %v1225_v45 = vpop.f32.mrf.mxu1 }
 0x1fb   :  { %v1046_v9 = vmul.f32 %v977_v26, %v934_v31  ;;  %v1226_v24 = vadd.f32 %v1225_v45, %v1224_v30  ;;  %v937_v26 = vmax.f32 %v863_v29, %v921_v44  ;;  %v922_v42 = vmul.f32 0.2, %v868_v21 }
 0x1fc   :  { %v1227_v47 = vpop.f32.mrf.mxu1 }
 0x1fd   :  { %v1061_v39 = vadd.f32 %v1060_v34, %v1046_v9  ;;  %v873_v40 = vadd.f32 %v1226_v24, %v1917_v6  ;;  %v1049_v52 = vmul.f32 %v1923_v59, %v937_v26  ;;  %v938_v2 = vmax.f32 %v868_v21, %v922_v42  ;;  %v1017_v1 = vpop.permute.xlu0 %1016 }
 0x1fe   :  { %v1228_v62 = vpop.f32.mrf.mxu1 }
 0x1ff   :  { %v1062_v36 = vadd.f32 %v1061_v39, %v1047_v41  ;;  %v1229_v51 = vadd.f32 %v1228_v62, %v1227_v47  ;;  %v923_v43 = vmul.f32 0.2, %v873_v40  ;;  %v1050_v10 = vmul.f32 %v997_v23, %v938_v2  ;;  %v769_v39 = vpop.permute.xlu1 %768 }
 0x200   :  { %v1230_v37 = vpop.f32.mrf.mxu1 }
 0x201   :  { %v1063_v58 = vadd.f32 %v1062_v36, %v1048_v56  ;;  %v878_v0 = vadd.f32 %v1229_v51, %v1921_v60  ;;  %v939_v11 = vmax.f32 %v873_v40, %v923_v43  ;;  %v1022_v45 = vpop.permute.xlu0 %1021 }
 0x202   :  { %v1231_v54 = vpop.f32.mrf.mxu1 }
 0x203   :  { %v1232_v61 = vadd.f32 %v1231_v54, %v1230_v37  ;;  %v1064_v49 = vadd.f32 %v1063_v58, %v1049_v52  ;;  %v924_v53 = vmul.f32 0.2, %v878_v0  ;;  %v1051_v28 = vmul.f32 %v1002_v8, %v939_v11 }
 0x204   :  { %v1233_v57 = vpop.f32.mrf.mxu1  ;;  %v1082_v11 = vstv %s1941_s6 }
 0x205   :  { %v883_v16 = vadd.f32 %v1232_v61, %v739_v18  ;;  %v1065_v25 = vadd.f32 %v1064_v49, %v1050_v10  ;;  %v940_v13 = vmax.f32 %v878_v0, %v924_v53  ;;  %v1027_v24 = vpop.permute.xlu0 %1026 }
 0x206   :  { %v1234_v14 = vpop.f32.mrf.mxu1 }
 0x207   :  { %v1235_v46 = vadd.f32 %v1234_v14, %v1233_v57  ;;  %v925_v12 = vmul.f32 0.2, %v883_v16  ;;  %v1052_v22 = vmul.f32 %v1007_v4, %v940_v13  ;;  %v1032_v57 = vpop.permute.xlu1 %1031 }
 0x208   :  { %v1236_v5 = vpop.f32.mrf.mxu1 }
 0x209   :  { %v888_v7 = vadd.f32 %v1235_v46, %v744_v27  ;;  %v941_v30 = vmax.f32 %v883_v16, %v925_v12  ;;  %v1066_v27 = vadd.f32 %v1065_v25, %v1051_v28  ;;  %v1037_v14 = vpop.permute.xlu0 %1036 }
 0x20a   :  { %v1237_v3 = vpop.f32.mrf.mxu1 }
 0x20b   :  { %v1238_v6 = vadd.f32 %v1237_v3, %v1236_v5  ;;  %v926_v59 = vmul.f32 0.2, %v888_v7  ;;  %v1053_v35 = vmul.f32 %v1012_v38, %v941_v30  ;;  %v1067_v62 = vadd.f32 %v1066_v27, %v1052_v22  ;;  %v1042_v16 = vpop.permute.xlu1 %1041 }
 0x20c   :  { %v1239_v48 = vpop.f32.mrf.mxu1 }
 0x20d   :  { %v893_v60 = vadd.f32 %v1238_v6, %v749_v33  ;;  %v942_v23 = vmax.f32 %v888_v7, %v926_v59  ;;  %v1068_v36 = vadd.f32 %v1067_v62, %v1053_v35 }
 0x20e   :  { %v1240_v15 = vpop.f32.mrf.mxu1 }
 0x20f   :  { %v1241_v50 = vadd.f32 %v1240_v15, %v1239_v48  ;;  %v927_v20 = vmul.f32 0.2, %v893_v60  ;;  %v1054_v63 = vmul.f32 %v1017_v1, %v942_v23 }
 0x210   :  { %v1242_v18 = vpop.f32.mrf.mxu1 }
 0x211   :  { %v898_v31 = vadd.f32 %v1241_v50, %v754_v55  ;;  %v943_v47 = vmax.f32 %v893_v60, %v927_v20  ;;  %v1069_v56 = vadd.f32 %v1068_v36, %v1054_v63 }
 0x212   :  { %v1243_v32 = vpop.f32.mrf.mxu1 }
 0x213   :  { %v928_v34 = vmul.f32 0.2, %v898_v31  ;;  %v1244_v9 = vadd.f32 %v1243_v32, %v1242_v18  ;;  %v1055_v51 = vmul.f32 %v1022_v45, %v943_v47 }
 0x214   :  { %v1245_v29 = vpop.f32.mrf.mxu1 }
 0x215   :  { %v903_v33 = vadd.f32 %v1244_v9, %v759_v19  ;;  %v944_v8 = vmax.f32 %v898_v31, %v928_v34  ;;  %v1070_v61 = vadd.f32 %v1069_v56, %v1055_v51 }
 0x216   :  { %v1246_v41 = vpop.f32.mrf.mxu1 }
 0x217   :  { %v929_v44 = vmul.f32 0.2, %v903_v33  ;;  %v1247_v21 = vadd.f32 %v1246_v41, %v1245_v29  ;;  %v1056_v26 = vmul.f32 %v1027_v24, %v944_v8 }
 0x218   :  { %v1248_v37 = vpop.f32.mrf.mxu1 }
 0x219   :  { %v945_v4 = vmax.f32 %v903_v33, %v929_v44  ;;  %v908_v54 = vadd.f32 %v1247_v21, %v764_v17  ;;  %v1071_v46 = vadd.f32 %v1070_v61, %v1056_v26 }
 0x21a   :  { %v1249_v55 = vpop.f32.mrf.mxu1 }
 0x21b   :  { %v930_v42 = vmul.f32 0.2, %v908_v54  ;;  %v1250_v40 = vadd.f32 %v1249_v55, %v1248_v37  ;;  %v1057_v38 = vmul.f32 %v1032_v57, %v945_v4 }
 0x21d   :  { %v946_v58 = vmax.f32 %v908_v54, %v930_v42  ;;  %v913_v0 = vadd.f32 %v1250_v40, %v769_v39  ;;  %v1072_v43 = vadd.f32 %v1071_v46, %v1057_v38 }
 0x21f   :  { %v1058_v52 = vmul.f32 %v1037_v14, %v946_v58  ;;  %v931_v2 = vmul.f32 0.2, %v913_v0 }
 0x221   :  { %v947_v5 = vmax.f32 %v913_v0, %v931_v2  ;;  %v1073_v19 = vadd.f32 %v1072_v43, %v1058_v52 }
 0x223   :  { %v1059_v49 = vmul.f32 %v1042_v16, %v947_v5 }
 0x225   :  { %v1074_v53 = vadd.f32 %v1073_v19, %v1059_v49 }
 0x227   :  { %v1075_v3 = vrot.slane %v1074_v53, 4 }
 0x229   :  { %v1076_v7 = vadd.f32 %v1075_v3, %v1074_v53 }
 0x22b   :  { %v1077_v6 = vrot.slane %v1076_v7, 2 }
 0x22d   :  { %v1078_v1 = vadd.f32 %v1077_v6, %v1076_v7 }
 0x22f   :  { %v1079_v10 = vrot.slane %v1078_v1, 1 }
 0x231   :  { %v1080_v48 = vadd.f32 %v1079_v10, %v1078_v1 }
 0x233   :  { %v1083_v12 = vadd.f32 %v1082_v11, %v1080_v48 }
 0x235   :  { %v1084_v60 = vsub.f32 0.0, %v1083_v12 }
 0x237   :  { %v1085_v25 = vmul.f32 1.442695, %v1084_v60 }
 0x239   :  { %1337 = vpow2.f32 %v1085_v25 }
 0x246   :  { %v1338_v13 = vpop.eup %1337 }
 0x247   :  { %v1087_v15 = vadd.f32 1.0, %v1338_v13 }
 0x249   :  { %1339 = vrcp.f32 %v1087_v15 }
 0x256   :  { %v1340_v59 = vpop.eup %1339 }
 0x257   :  { %1090 = vst [vmem:[#allocation3] sm:$0x1] %v1340_v59 }
 0x258   :  { %1352 = shalt.err (!%p1349_p4)
}
 0x259   :  { %1100 = dma.vmem_to_hbm [thread:$0]  %s1098_s28, 16, %s1942_s7, [#allocation4]  }
 0x25a   :  { %1361 = dma.done.wait [#allocation4], 16  }
 0x25b   :  { %1362 = vsyncadd [#allocation4], 4294967280 }
 0x25c   :  { %1104 = vsyncpa [#allocation4], 1 }

</bundles_post_ra>
